<compile_context>
chip_gen: v7x
topology: tpu7x:2x2x1
jax: 0.10.0
libtpu: 0.0.40
codegen_flags: <defaults>
</compile_context>

<pallas_src>
import jax
import jax.numpy as jnp
from jax.experimental import pallas as pl
from jax.experimental.pallas import tpu as pltpu


def _round_up(n: int, m: int) -> int:
    return ((n + m - 1) // m) * m


def _make_symbol_game_kernel(V: int, Vp: int, use_bf16_matmul: bool):
    """Builds the fused sender -> receiver -> per-row-loss kernel.

    Kernel refs:
      x_ref:   (TB, Dp) sender_input tile (zero-padded feature cols), f32, VMEM
      w_ref:   (Dp, Vp) linear weight (resident across grid), f32, VMEM
      b_ref:   (1, Vp)  linear bias  (resident across grid), f32, VMEM
      msg_ref: (TB, Vp) message tile (log-softmax of logits)
      sse_ref: (TB, 1)  per-row sum of squared error over valid columns
    """
    mask_cols = Vp > V

    def kernel(x_ref, w_ref, b_ref, msg_ref, sse_ref):
        x = x_ref[...]                                            # (TB, Dp)
        w = w_ref[...]                                            # (Dp, Vp)

        # --- Sender: Linear (MXU) + LogSoftmax(dim=1) ---
        if use_bf16_matmul:
            logits = jnp.dot(x.astype(jnp.bfloat16), w.astype(jnp.bfloat16),
                             preferred_element_type=jnp.float32)
        else:
            logits = jnp.dot(x, w, preferred_element_type=jnp.float32)
        logits = logits + b_ref[...]                              # (TB, Vp)

        if mask_cols:
            col = jax.lax.broadcasted_iota(jnp.int32, logits.shape, 1)
            valid = col < V
            logits = jnp.where(valid, logits, -jnp.inf)           # exact softmax mask

        m = jnp.max(logits, axis=-1, keepdims=True)               # (TB, 1)
        shifted = logits - m
        lse = jnp.log(jnp.sum(jnp.exp(shifted), axis=-1, keepdims=True))
        message = shifted - lse                                   # log-probs (TB, Vp)
        msg_ref[...] = message

        # --- Receiver: identity -> receiver_output == message ---
        # --- Loss partials: per-row sum((x - message)^2) over valid cols ---
        # (mean over dim=1 then mean over batch is done in the wrapper; valid
        #  only because D == V for the identity receiver + MSE loss.)
        diff = x - message
        sq = diff * diff
        if mask_cols:
            sq = jnp.where(valid, sq, 0.0)
        sse_ref[...] = jnp.sum(sq, axis=-1, keepdims=True)        # (TB, 1)

    return kernel


def _pick_tile_b(B: int, Dp: int, Vp: int) -> int:
    """Batch tile: as large as fits a conservative VMEM budget, multiple of 8."""
    per_row = 2 * (Dp + Vp + 1) * 4          # double-buffered x + msg (+ sse), f32
    budget = (28 << 20) - Dp * Vp * 4 - 2 * Vp * 4   # weight + bias are resident
    tb = budget // per_row if budget > 0 else 8
    tb = int(max(8, min(1024, tb)))
    tb = (tb // 8) * 8
    tb = min(tb, _round_up(B, 8))
    return max(8, tb)


def _pallas_forward(x, w, b, *, tile_b=None, use_bf16_matmul=False):
    B, D = x.shape
    V = w.shape[1]

    Dp = _round_up(D, 128)
    Vp = _round_up(V, 128)
    if tile_b is None:
        TB = _pick_tile_b(B, Dp, Vp)
    else:
        TB = max(8, (int(tile_b) // 8) * 8)
        TB = min(TB, _round_up(B, 8))
    num_tiles = pl.cdiv(B, TB)
    Bp = num_tiles * TB

    x_p = jnp.pad(x, ((0, Bp - B), (0, Dp - D))) if (Bp != B or Dp != D) else x
    w_p = jnp.pad(w, ((0, Dp - D), (0, Vp - V))) if (Dp != D or Vp != V) else w
    b_p = b.reshape(1, V)
    if Vp != V:
        b_p = jnp.pad(b_p, ((0, 0), (0, Vp - V)))

    kernel = _make_symbol_game_kernel(V=V, Vp=Vp, use_bf16_matmul=use_bf16_matmul)

    # VMEM estimate: double-buffered x & msg tiles + sse + resident weight/bias.
    est_bytes = (2 * TB * (Dp + Vp + 1) + Dp * Vp + 2 * Vp) * 4
    vmem_limit = int(min(max(2 * est_bytes, 32 << 20), 64 << 20))  # v7x-safe cap

    msg_p, sse_p = pl.pallas_call(
        kernel,
        grid=(num_tiles,),
        in_specs=[
            pl.BlockSpec((TB, Dp), lambda i: (i, 0)),   # x: tiled over batch
            pl.BlockSpec((Dp, Vp), lambda i: (0, 0)),   # w: resident
            pl.BlockSpec((1, Vp), lambda i: (0, 0)),    # b: resident
        ],
        out_specs=(
            pl.BlockSpec((TB, Vp), lambda i: (i, 0)),   # message (lane-dense)
            pl.BlockSpec((TB, 1), lambda i: (i, 0)),    # per-row SSE partials
        ),
        out_shape=(
            jax.ShapeDtypeStruct((Bp, Vp), jnp.float32),
            jax.ShapeDtypeStruct((Bp, 1), jnp.float32),
        ),
        compiler_params=pltpu.CompilerParams(
            dimension_semantics=("parallel",),
            vmem_limit_bytes=vmem_limit,
        ),
    )(x_p, w_p, b_p)

    message = msg_p[:B, :V]
    # mean(dim=1) then mean over batch == sum(valid SSE) / (B * D).
    loss = jnp.sum(sse_p[:B, 0]) / jnp.float32(B * D)
    return loss, message


def _plain_forward(x, w, b):
    """Tiny-problem fallback: XLA fusion beats pallas_call fixed overhead."""
    logits = x @ w + b
    message = jax.nn.log_softmax(logits, axis=1)
    loss = jnp.mean(jnp.mean((x - message) ** 2, axis=1))
    return loss, message


def symbol_game_gs_forward(sender_input, w, b, labels=None, receiver_input=None,
                           *, tile_b=None, use_bf16_matmul=False, force_pallas=None):
    """Runs the SymbolGameGS forward. Returns (loss_scalar, interaction_dict)."""
    x = jnp.asarray(sender_input, jnp.float32)
    w = jnp.asarray(w, jnp.float32)
    b = jnp.asarray(b, jnp.float32)
    B, D = x.shape
    V = w.shape[1]
    assert D == V, "identity receiver + MSE loss require features == vocab_size"

    if force_pallas is None:
        use_pallas = B * max(D, V) >= (1 << 14)   # skip Pallas for tiny problems
    else:
        use_pallas = force_pallas

    if use_pallas:
        loss, message = _pallas_forward(x, w, b, tile_b=tile_b,
                                        use_bf16_matmul=use_bf16_matmul)
    else:
        loss, message = _plain_forward(x, w, b)

    # TODO(synk): LoggingStrategy filtering / Interaction dataclass has no Pallas
    # equivalent; represented as a plain dict of (detached) arrays.
    interaction = {
        "sender_input": x,
        "receiver_input": receiver_input,
        "labels": labels,
        "receiver_output": jax.lax.stop_gradient(message),
        "message": jax.lax.stop_gradient(message),
        "message_length": jnp.ones((B,), dtype=jnp.float32),
        "aux": {},
    }
    return loss, interaction


def init_sender_params(key, in_features, out_features):
    """Deterministic init mimicking torch.nn.Linear (uniform +/- 1/sqrt(in))."""
    kw, kb = jax.random.split(key)
    bound = 1.0 / jnp.sqrt(jnp.float32(in_features))
    w = jax.random.uniform(kw, (in_features, out_features), jnp.float32, -bound, bound)
    b = jax.random.uniform(kb, (out_features,), jnp.float32, -bound, bound)
    return w, b


def _reference(x, w, b):
    logits = x @ w + b
    msg = jax.nn.log_softmax(logits, axis=1)
    loss = jnp.mean(jnp.mean((x - msg) ** 2, axis=1))
    return loss, msg


if __name__ == "__main__":
    key = jax.random.PRNGKey(0)
    k_x1, k_p1, k_x2, k_p2, k_x3, k_p3 = jax.random.split(key, 6)

    # --- Case A: small, heavily padded shapes, forced through the Pallas kernel ---
    B1, D1 = 8, 32
    x1 = jax.random.normal(k_x1, (B1, D1), dtype=jnp.float32)
    w1, b1 = init_sender_params(k_p1, D1, D1)
    loss1, inter1 = symbol_game_gs_forward(x1, w1, b1, labels=None, force_pallas=True)
    loss1 = jax.block_until_ready(loss1)
    jax.block_until_ready(inter1["message"])
    loss1_ref, msg1_ref = _reference(x1, w1, b1)
    assert jnp.allclose(loss1, loss1_ref, rtol=1e-4, atol=1e-4), (loss1, loss1_ref)
    assert jnp.allclose(inter1["message"], msg1_ref, rtol=1e-4, atol=1e-4)
    assert bool(loss1 > 0)

    # --- Case B: non-aligned B/D, multi-tile grid (row+col padding, parallel axis) ---
    B2, D2 = 500, 200
    x2 = jax.random.normal(k_x2, (B2, D2), dtype=jnp.float32)
    w2, b2 = init_sender_params(k_p2, D2, D2)
    loss2, inter2 = symbol_game_gs_forward(x2, w2, b2, labels=None,
                                           tile_b=128, force_pallas=True)
    loss2 = jax.block_until_ready(loss2)
    jax.block_until_ready(inter2["message"])
    loss2_ref, msg2_ref = _reference(x2, w2, b2)
    assert jnp.allclose(loss2, loss2_ref, rtol=2e-3, atol=2e-3), (loss2, loss2_ref)
    assert jnp.allclose(inter2["message"], msg2_ref, rtol=2e-3, atol=2e-3)
    assert bool(loss2 > 0)

    # --- Case C: docstring-sized problem -> gated to the plain-JAX fallback ---
    B3, D3 = 2, 10
    x3 = jnp.ones((B3, D3), dtype=jnp.float32)
    w3, b3 = init_sender_params(k_p3, D3, D3)
    loss3, inter3 = symbol_game_gs_forward(x3, w3, b3, labels=None)
    loss3 = jax.block_until_ready(loss3)
    assert inter3["aux"] == {}
    assert bool(loss3 > 0)

    print("KERNEL_OK")
</pallas_src>

<mosaic_0001>
module attributes {stable_mosaic.version = 11 : i64} {
  func.func @kernel(%arg0: i32, %arg1: memref<8x128xf32, #tpu.memory_space<vmem>>, %arg2: memref<128x128xf32, #tpu.memory_space<vmem>>, %arg3: memref<1x128xf32, #tpu.memory_space<vmem>>, %arg4: memref<8x128xf32, #tpu.memory_space<vmem>>, %arg5: memref<8x1xf32, #tpu.memory_space<vmem>>) attributes {dimension_semantics = [#tpu.dimension_semantics<parallel>], iteration_bounds = array<i64: 1>, scalar_prefetch = 0 : i64, scratch_operands = 0 : i64, tpu.core_type = #tpu.core_type<tc>, window_params = [{transform_indices = @transform_0, window_bounds = array<i64: 8, 128>}, {pipeline_mode = #tpu.pipeline_mode<synchronous>, transform_indices = @transform_1, window_bounds = array<i64: 128, 128>}, {pipeline_mode = #tpu.pipeline_mode<synchronous>, transform_indices = @transform_2, window_bounds = array<i64: 1, 128>}, {transform_indices = @transform_3, window_bounds = array<i64: 8, 128>}, {transform_indices = @transform_4, window_bounds = array<i64: 8, 1>}]} {
    %c0 = arith.constant 0 : index
    %c0_0 = arith.constant 0 : index
    %0 = vector.load %arg1[%c0, %c0_0] : memref<8x128xf32, #tpu.memory_space<vmem>>, vector<8x128xf32>
    %c0_1 = arith.constant 0 : index
    %c0_2 = arith.constant 0 : index
    %1 = vector.load %arg2[%c0_1, %c0_2] : memref<128x128xf32, #tpu.memory_space<vmem>>, vector<128x128xf32>
    %cst = arith.constant dense<0.000000e+00> : vector<8x128xf32>
    %2 = tpu.matmul %0, %1, %cst {dimension_numbers = #tpu.dot_dimension_numbers<[1], [0], [0], [1], [0, 0, 1, 1], [], []>} : vector<8x128xf32>, vector<128x128xf32>, vector<8x128xf32> -> vector<8x128xf32>
    %c0_3 = arith.constant 0 : index
    %c0_4 = arith.constant 0 : index
    %3 = vector.load %arg3[%c0_3, %c0_4] : memref<1x128xf32, #tpu.memory_space<vmem>>, vector<1x128xf32>
    %4 = vector.broadcast %3 : vector<1x128xf32> to vector<8x128xf32>
    %5 = arith.addf %2, %4 : vector<8x128xf32>
    %6 = tpu.iota {dimensions = array<i32: 1>} : vector<8x128xi32>
    %c32_i32 = arith.constant 32 : i32
    %7 = vector.broadcast %c32_i32 : i32 to vector<8x128xi32>
    %8 = arith.cmpi slt, %6, %7 : vector<8x128xi32>
    %cst_5 = arith.constant 0xFF800000 : f32
    %9 = vector.broadcast %cst_5 : f32 to vector<8x128xf32>
    %10 = arith.select %8, %5, %9 : vector<8x128xi1>, vector<8x128xf32>
    %cst_6 = arith.constant dense<0xFF800000> : vector<8xf32>
    %11 = vector.multi_reduction <maximumf>, %10, %cst_6 [1] : vector<8x128xf32> to vector<8xf32>
    %12 = vector.shape_cast %11 : vector<8xf32> to vector<8x1xf32>
    %13 = vector.broadcast %12 : vector<8x1xf32> to vector<8x128xf32>
    %14 = arith.subf %10, %13 : vector<8x128xf32>
    %15 = math.exp %14 : vector<8x128xf32>
    %cst_7 = arith.constant dense<0.000000e+00> : vector<8xf32>
    %16 = vector.multi_reduction <add>, %15, %cst_7 [1] : vector<8x128xf32> to vector<8xf32>
    %17 = vector.shape_cast %16 : vector<8xf32> to vector<8x1xf32>
    %18 = math.log %17 : vector<8x1xf32>
    %19 = vector.broadcast %18 : vector<8x1xf32> to vector<8x128xf32>
    %20 = arith.subf %14, %19 : vector<8x128xf32>
    %c0_8 = arith.constant 0 : index
    %c0_9 = arith.constant 0 : index
    %21 = vector.load %arg4[%c0_8, %c0_9] : memref<8x128xf32, #tpu.memory_space<vmem>>, vector<8x128xf32>
    tpu.vector_store %arg4[%c0_8, %c0_9], %20 {strides = array<i32>} : memref<8x128xf32, #tpu.memory_space<vmem>>, vector<8x128xf32>,
    %22 = arith.subf %0, %20 : vector<8x128xf32>
    %23 = arith.mulf %22, %22 : vector<8x128xf32>
    %cst_10 = arith.constant 0.000000e+00 : f32
    %24 = vector.broadcast %cst_10 : f32 to vector<8x128xf32>
    %25 = arith.select %8, %23, %24 : vector<8x128xi1>, vector<8x128xf32>
    %cst_11 = arith.constant dense<0.000000e+00> : vector<8xf32>
    %26 = vector.multi_reduction <add>, %25, %cst_11 [1] : vector<8x128xf32> to vector<8xf32>
    %27 = vector.shape_cast %26 : vector<8xf32> to vector<8x1xf32>
    %c0_12 = arith.constant 0 : index
    %c0_13 = arith.constant 0 : index
    %28 = vector.load %arg5[%c0_12, %c0_13] : memref<8x1xf32, #tpu.memory_space<vmem>>, vector<8x1xf32>
    tpu.vector_store %arg5[%c0_12, %c0_13], %27 {strides = array<i32>} : memref<8x1xf32, #tpu.memory_space<vmem>>, vector<8x1xf32>,
    return
  }
  func.func @transform_0(%arg0: i32) -> (i32, i32) {
    %c0_i32 = arith.constant 0 : i32
    %c0_i32_0 = arith.constant 0 : i32
    return %arg0, %c0_i32 : i32, i32
  }
  func.func @transform_1(%arg0: i32) -> (i32, i32) {
    %c0_i32 = arith.constant 0 : i32
    %c0_i32_0 = arith.constant 0 : i32
    %c0_i32_1 = arith.constant 0 : i32
    return %c0_i32, %c0_i32_0 : i32, i32
  }
  func.func @transform_2(%arg0: i32) -> (i32, i32) {
    %c0_i32 = arith.constant 0 : i32
    %c0_i32_0 = arith.constant 0 : i32
    %c0_i32_1 = arith.constant 0 : i32
    return %c0_i32, %c0_i32_0 : i32, i32
  }
  func.func @transform_3(%arg0: i32) -> (i32, i32) {
    %c0_i32 = arith.constant 0 : i32
    %c0_i32_0 = arith.constant 0 : i32
    return %arg0, %c0_i32 : i32, i32
  }
  func.func @transform_4(%arg0: i32) -> (i32, i32) {
    %c0_i32 = arith.constant 0 : i32
    %c0_i32_0 = arith.constant 0 : i32
    return %arg0, %c0_i32 : i32, i32
  }
}

</mosaic_0001>

<bundles_post_ra>
// kernel: tpu_custom_call.1
= control target key start
LH: loop header
LB: loop body
LE: loop exit
PB: predicated region body
PF: predicated region fallthrough
CT: control target
= control target key end

     0   :  { %10 = vsyncpa [#allocation3], 0  ;;  %s424_s0 = inlined_call_operand.hbm [shape: f32[8,128], index: 0, kind: input, shape index: {}]   ;;  %s425_s1 = inlined_call_operand.hbm [shape: f32[128,128], index: 1, kind: input, shape index: {}]   ;;  %s426_s2 = inlined_call_operand.vmem [shape: f32[1,128], index: 2, kind: input, shape index: {}]   ;;  %s427_s3 = inlined_call_operand.hbm [shape: f32[8,128], index: 3, kind: output, shape index: {0}]   ;;  %s428_s4 = inlined_call_operand.vmem [shape: f32[8,1], index: 4, kind: output, shape index: {1}]  }
   0x1   :  { %11 = vsyncpa [#allocation6], 0 }
   0x2   :  { %12 = vsyncpa [#allocation4], 0  ;;  %s340_s15 = smov [#allocation2]   ;;  %s341_s17 = smov [#allocation5]  }
   0x3   :  { %s19_s16 = sshll.u32 %s340_s15, 4  ;;  %s28_s18 = sshll.u32 %s341_s17, 4  ;;  %s20_s16 = int_to_ptr.vmem [resolvable:$true] %s19_s16  ;;  %s373_s18 = int_to_ptr.vmem [resolvable:$true] %s28_s18 }
   0x4   :  { %s268_s21 = scalar_lea.hbm %s424_s0, 128 }
   0x5   :  { %p269_p0 = scmp.ne.s32.totalorder %s424_s0, %s268_s21  ;;  %p272_p1 = scmp.lt.u32.totalorder %s268_s21, %s424_s0 }
   0x7   :  { %p274_p2 = pnand %p272_p1, %p269_p0 }
   0x9   :  { %277 = shalt.err (!%p274_p2)
}
   0xa   :  { %s278_s26 = scalar_lea.vmem %s20_s16, 128  ;;  %p283_p4 = scmp.lt.s32.totalorder %s20_s16, %s20_s16 }
   0xb   :  { %p279_p3 = scmp.ne.s32.totalorder %s20_s16, %s278_s26  ;;  %p284_p5 = scmp.lt.s32.totalorder %s278_s26, %s278_s26 }
   0xd   :  { %p285_p6 = por %p284_p5, %p283_p4 }
   0xf   :  { %p286_p7 = pnand %p285_p6, %p279_p3 }
  0x11   :  { %289 = shalt.err (!%p286_p7)
}
  0x12   :  { %22 = dma.hbm_to_vmem [thread:$0]  %s424_s0, 128, %s20_s16, [#allocation3]  }
  0x13   :  { %s290_s5 = scalar_lea.hbm %s425_s1, 2048 }
  0x14   :  { %p291_p8 = scmp.ne.s32.totalorder %s425_s1, %s290_s5  ;;  %p294_p9 = scmp.lt.u32.totalorder %s290_s5, %s425_s1 }
  0x16   :  { %p296_p10 = pnand %p294_p9, %p291_p8 }
  0x18   :  { %299 = shalt.err (!%p296_p10)
}
  0x19   :  { %s300_s10 = scalar_lea.vmem %s373_s18, 2048  ;;  %p305_p12 = scmp.lt.s32.totalorder %s373_s18, %s373_s18 }
  0x1a   :  { %p301_p11 = scmp.ne.s32.totalorder %s373_s18, %s300_s10  ;;  %p306_p13 = scmp.lt.s32.totalorder %s300_s10, %s300_s10 }
  0x1c   :  { %p307_p0 = por %p306_p13, %p305_p12 }
  0x1e   :  { %p308_p1 = pnand %p307_p0, %p301_p11 }
  0x20   :  { %311 = shalt.err (!%p308_p1)
}
  0x21   :  { %s342_s0 = smov 128   ;;  %s343_s11 = smov 8  }
  0x22   :  { %34 = dma.hbm_to_vmem [thread:$0]  %s425_s1, 2048, %s373_s18, [#allocation6], %s342_s0, %s342_s0, %s343_s11  }
  0x23   :  { %334 = dma.done.wait [#allocation3], 128  }
  0x24   :  { %335 = vsyncadd [#allocation3], 4294967168 }
  0x25   :  { %336 = dma.done.wait [#allocation6], 2048  }
  0x26   :  { %337 = vsyncadd [#allocation6], 4294965248  ;;  %v344_v0 = vmov 0.0|0.0   ;;  %vm345_vm0 = vmmov 0   ;;  %v346_v1 = vmov 0.0   ;;  %v44_v2 = vld [vmem:[#allocation5] sm:$0xff]  ;;  %v137_v27 = vlaneseq }
  0x27   :  { %232 = vmatprep.subr.bf16.mxu0 %v344_v0  ;;  %229 = vmatprep.mubr.msk.f32.mxu0 %vm345_vm0, %v346_v1  ;;  %v45_v3 = vld [vmem:[#allocation5 + $0x8] sm:$0xff]  ;;  %v46_v4 = vld [vmem:[#allocation5 + $0x10] sm:$0xff]  ;;  %v47_v6 = vld [vmem:[#allocation5 + $0x18] sm:$0xff] }
  0x28   :  { %v233_v5 = vpack.c.bf16 %v45_v3, %v44_v2  ;;  %v236_v7 = vpack.c.bf16 %v47_v6, %v46_v4  ;;  %v48_v8 = vld [vmem:[#allocation5 + $0x20] sm:$0xff]  ;;  %v49_v9 = vld [vmem:[#allocation5 + $0x28] sm:$0xff]  ;;  %v50_v11 = vld [vmem:[#allocation5 + $0x30] sm:$0xff]  ;;  %v138_v28 = vand.u32 127, %v137_v27 }
  0x29   :  { %v239_v10 = vpack.c.bf16 %v49_v9, %v48_v8  ;;  %v51_v12 = vld [vmem:[#allocation5 + $0x38] sm:$0xff]  ;;  %v52_v14 = vld [vmem:[#allocation5 + $0x40] sm:$0xff]  ;;  %v53_v15 = vld [vmem:[#allocation5 + $0x48] sm:$0xff] }
  0x2a   :  { %234 = vmatpush3.bf16.msra.mxu0 %v233_v5  ;;  %v242_v13 = vpack.c.bf16 %v51_v12, %v50_v11  ;;  %v245_v16 = vpack.c.bf16 %v53_v15, %v52_v14  ;;  %v54_v17 = vld [vmem:[#allocation5 + $0x50] sm:$0xff]  ;;  %v55_v18 = vld [vmem:[#allocation5 + $0x58] sm:$0xff]  ;;  %v56_v20 = vld [vmem:[#allocation5 + $0x60] sm:$0xff]  ;;  %vm139_vm1 = vcmp.lt.s32.totalorder %v138_v28, 32 }
  0x2b   :  { %235 = vmatprep.subr.bf16.mxu0 %v344_v0  ;;  %v248_v19 = vpack.c.bf16 %v55_v18, %v54_v17  ;;  %v57_v21 = vld [vmem:[#allocation5 + $0x68] sm:$0xff]  ;;  %v58_v23 = vld [vmem:[#allocation5 + $0x70] sm:$0xff]  ;;  %v59_v24 = vld [vmem:[#allocation5 + $0x78] sm:$0xff] }
  0x2c   :  { %v251_v22 = vpack.c.bf16 %v57_v21, %v56_v20  ;;  %v254_v25 = vpack.c.bf16 %v59_v24, %v58_v23  ;;  %v43_v26 = vld [vmem:[#allocation2] sm:$0xff] }
  0x2d   :  { %v179_v29 = vld [vmem:[%s426_s2] ss:$0 sm:$0xff]  ;;  %s347_s2 = smov [#allocation7]  }
  0x2e   :  { %237 = vmatpush3.bf16.msra.mxu0 %v236_v7  ;;  %s165_s15 = sshll.u32 %s347_s2, 4  ;;  %s166_s15 = int_to_ptr.vmem [resolvable:$true] %s165_s15 }
  0x2f   :  { %238 = vmatprep.subr.bf16.mxu0 %v344_v0  ;;  %s312_s16 = scalar_lea.vmem %s166_s15, 128  ;;  %p317_p3 = scmp.lt.s32.totalorder %s166_s15, %s166_s15 }
  0x30   :  { %p313_p2 = scmp.ne.s32.totalorder %s166_s15, %s312_s16  ;;  %p318_p4 = scmp.lt.s32.totalorder %s312_s16, %s312_s16 }
  0x32   :  { %240 = vmatpush3.bf16.msra.mxu0 %v239_v10  ;;  %p319_p5 = por %p318_p4, %p317_p3 }
  0x33   :  { %241 = vmatprep.subr.bf16.mxu0 %v344_v0 }
  0x34   :  { %p320_p6 = pnand %p319_p5, %p313_p2 }
  0x36   :  { %243 = vmatpush3.bf16.msra.mxu0 %v242_v13 }
  0x37   :  { %244 = vmatprep.subr.bf16.mxu0 %v344_v0 }
  0x3a   :  { %246 = vmatpush3.bf16.msra.mxu0 %v245_v16 }
  0x3b   :  { %247 = vmatprep.subr.bf16.mxu0 %v344_v0 }
  0x3e   :  { %249 = vmatpush3.bf16.msra.mxu0 %v248_v19 }
  0x3f   :  { %250 = vmatprep.subr.bf16.mxu0 %v344_v0 }
  0x42   :  { %252 = vmatpush3.bf16.msra.mxu0 %v251_v22 }
  0x43   :  { %253 = vmatprep.subr.bf16.mxu0 %v344_v0 }
  0x46   :  { %255 = vmatpush3.bf16.msra.mxu0 %v254_v25 }
  0x49   :  { %230 = vmatmul.mubr.f32.vlgmr.msra.gmra.mrb[0].mxu0 %v43_v26 }
 0x11c   :  { %v133_v30 = vpop.f32.mrb[0].mxu0 }
 0x11d   :  { %v134_v31 = vadd.f32 %v179_v29, %v133_v30  ;;  %v231_v32 = vpop.f32.mrb[1].mxu0 }
 0x11f   :  { %v140_v33 = vsel %vm139_vm1, %v134_v31, -inf }
 0x120   :  { %141 = vmax.xlane.f32.xlu0 %v140_v33 }
 0x1ad   :  { %v142_v34 = vpop.xlane.xlu0 %141 }
 0x1ae   :  { %v143_v35 = vsub.f32 %v140_v33, %v142_v34 }
 0x1b0   :  { %v144_v36 = vmul.f32 1.442695, %v143_v35 }
 0x1b2   :  { %264 = vpow2.f32 %v144_v36 }
 0x1bc   :  { %v265_v37 = vpop.eup %264 }
 0x1bd   :  { %146 = vadd.xlane.f32.xlu0 %v265_v37 }
 0x24a   :  { %v147_v38 = vpop.xlane.xlu0 %146 }
 0x24b   :  { %266 = vlog2.f32 %v147_v38 }
 0x255   :  { %v267_v39 = vpop.eup %266 }
 0x256   :  { %v149_v40 = vmul.f32 0.6931472, %v267_v39 }
 0x258   :  { %v150_v41 = vsub.f32 %v143_v35, %v149_v40 }
 0x25a   :  { %v152_v42 = vsub.f32 %v43_v26, %v150_v41  ;;  %151 = vst [vmem:[#allocation7] sm:$0xff] %v150_v41 }
 0x25c   :  { %v153_v43 = vmul.f32 %v152_v42, %v152_v42 }
 0x25e   :  { %v154_v44 = vsel %vm139_vm1, %v153_v43, 0.0 }
 0x25f   :  { %155 = vadd.xlane.f32.xlu1 %v154_v44 }
 0x260   :  { %323 = shalt.err (!%p320_p6)
}
 0x261   :  { %s324_s19 = scalar_lea.hbm %s427_s3, 128 }
 0x262   :  { %p325_p7 = scmp.ne.s32.totalorder %s427_s3, %s324_s19  ;;  %p328_p8 = scmp.lt.u32.totalorder %s324_s19, %s427_s3 }
 0x264   :  { %p330_p9 = pnand %p328_p8, %p325_p7 }
 0x266   :  { %333 = shalt.err (!%p330_p9)
}
 0x267   :  { %168 = dma.vmem_to_hbm [thread:$0]  %s166_s15, 128, %s427_s3, [#allocation4]   ;;  %vm157_vm2 = vcmask 7168  }
 0x2ec   :  { %v156_v45 = vpop.xlane.xlu1 %155 }
 0x2ed   :  { %158 = vst.msk [vmem:[%s428_s4] sm:$0xff] %vm157_vm2, %v156_v45 }
 0x2ee   :  { %338 = dma.done.wait [#allocation4], 128  }
 0x2ef   :  { %339 = vsyncadd [#allocation4], 4294967168 }
 0x2f0   :  { %176 = vsyncpa [#allocation3], 1 }
 0x2f1   :  { %177 = vsyncpa [#allocation6], 1 }
 0x2f2   :  { %178 = vsyncpa [#allocation4], 1 }

</bundles_post_ra>
